<compile_context>
chip_gen: v7x
topology: tpu7x:2x2x1
jax: 0.10.0
libtpu: 0.0.40
codegen_flags: <defaults>
</compile_context>

<pallas_src>
import functools

import jax
import jax.numpy as jnp
from jax import lax
from jax.experimental import pallas as pl
from jax.experimental.pallas import tpu as pltpu


def _round_up(v: int, m: int) -> int:
    return ((v + m - 1) // m) * m


def _cdiv(a: int, b: int) -> int:
    return (a + b - 1) // b


def _tpu_hw_defaults():
    """Best-effort, generation-aware MXU width / physical VMEM detection."""
    kind = ""
    try:
        kind = jax.devices()[0].device_kind.lower()
    except Exception:
        pass
    mxu = 256 if ("v6" in kind or "v7" in kind) else 128
    if "v7" in kind:
        phys_vmem = 64 * 2**20
    elif any(g in kind for g in ("v4", "v5", "v6")):
        phys_vmem = 128 * 2**20
    else:
        phys_vmem = 64 * 2**20          # conservative default for unknown parts
    try:                                # prefer the real number when available
        info = pltpu.get_tpu_info()
        for attr in ("vmem_capacity_bytes", "vmem_bytes", "vmem_size_bytes"):
            v = getattr(info, attr, None)
            if v:
                phys_vmem = int(v)
                break
    except Exception:
        pass
    return mxu, phys_vmem


def _plan_tiles(n, tq_cap):
    """Pick a q-tile size that minimizes N padding (multiple of 16 for bf16)."""
    nq = _cdiv(n, tq_cap)
    tq = min(_round_up(_cdiv(n, nq), 16), _round_up(tq_cap, 16))
    return tq, nq, nq * tq


def _csa_kernel(n_real, n_pad, tq,
                x_ref, y_ref, wq_ref, wk_ref, bq_ref, bk_ref,
                o_ref, k_scratch):
    """One (batch, q-tile) grid step.

    x_ref:     (N_pad, D_pad)   global descriptor for this batch (resident, bf16)
    y_ref:     (N_pad, C_pad)   image features for this batch (resident, bf16)
    wq_ref:    (D_pad, L_pad)   q projection weight (scale folded in, bf16)
    wk_ref:    (D_pad, L_pad)   k projection weight (bf16)
    bq_ref:    (1, L_pad)       q bias (scale folded in, f32)
    bk_ref:    (1, L_pad)       k bias (f32)
    o_ref:     (tq, C_pad)      output tile
    k_scratch: (N_pad, L_pad)   bf16 k projection, computed once per batch
    """
    qi = pl.program_id(1)

    # k projection for the whole batch element, once.  The q-tile axis is the
    # inner "arbitrary" grid axis, so the scratch persists across q tiles.
    @pl.when(qi == 0)
    def _():
        k_f32 = jnp.dot(x_ref[...], wk_ref[...],
                        preferred_element_type=jnp.float32)
        k_scratch[...] = (k_f32 + bk_ref[...]).astype(k_scratch.dtype)

    # q projection for just this tile (tiny matmul, spread across grid steps).
    row0 = pl.multiple_of(qi * tq, tq)
    x_tile = x_ref[pl.ds(row0, tq), :]                          # (tq, D_pad) bf16
    q = (jnp.dot(x_tile, wq_ref[...], preferred_element_type=jnp.float32)
         + bq_ref[...])                                         # (tq, L_pad) f32, scaled
    q = q.astype(k_scratch.dtype)                               # bf16 MXU operand

    # q @ k^T without materializing a transpose of k (contract last dims).
    k = k_scratch[...]                                          # (N_pad, L_pad) bf16
    s = lax.dot_general(q, k, dimension_numbers=(((1,), (1,)), ((), ())),
                        preferred_element_type=jnp.float32)     # (tq, N_pad) f32

    if n_pad > n_real:  # static: mask padded key columns out of the softmax
        col = lax.broadcasted_iota(jnp.int32, (tq, n_pad), 1)
        s = jnp.where(col < n_real, s, -jnp.inf)

    # numerically-stable softmax over the key axis (f32 VPU/EUP math)
    s = s - jnp.max(s, axis=-1, keepdims=True)
    p = jnp.exp(s)
    attn = p * pl.reciprocal(jnp.sum(p, axis=-1, keepdims=True), approx=True)

    # weighted sum of image features: (tq, N_pad) @ (N_pad, C_pad), bf16 operands
    y = y_ref[...]
    out = jnp.dot(attn.astype(y.dtype), y, preferred_element_type=jnp.float32)
    o_ref[...] = out.astype(o_ref.dtype)


def cs_attention(x, y, w_qk, b_qk, latent_dim, qk_scale=None, tq_max=None,
                 matmul_dtype=jnp.bfloat16):
    """Pallas implementation of CSAttention.forward.

    x:    (B, N, dim)        global descriptor
    y:    (B, N, C)          image features
    w_qk: (dim, 2*latent)    qk linear weight, laid out for x @ W
    b_qk: (2*latent,)        qk linear bias
    """
    B, N, D = x.shape
    _, _, C = y.shape
    out_dtype = y.dtype
    scale = qk_scale if qk_scale is not None else float(latent_dim) ** (-0.5)

    # ---- generation-aware tiling / VMEM budget ------------------------------
    mxu, phys_vmem = _tpu_hw_defaults()
    if tq_max is None:
        tq_max = mxu

    l_pad = _round_up(latent_dim, 128)          # lane-dense latent
    c_pad = _round_up(C, 128)                   # lane-dense output channels
    d_pad = _round_up(D, 128)                   # lane-dense input channels

    item_mm = jnp.dtype(matmul_dtype).itemsize
    item_out = jnp.dtype(out_dtype).itemsize

    def vmem_estimate(tq, n_pad):
        return (2 * n_pad * d_pad * item_mm        # x block (double-buffered)
                + 2 * n_pad * c_pad * item_mm      # y block
                + 2 * 2 * d_pad * l_pad * item_mm  # Wq + Wk
                + 2 * tq * c_pad * item_out        # output tile
                + n_pad * l_pad * item_mm          # k-projection scratch
                + 4 * tq * n_pad * 4               # score / softmax temporaries
                + 2 * tq * l_pad * 4)              # q-tile temporaries

    tq, nq, n_pad = _plan_tiles(N, tq_max)
    if tq_max > 128 and vmem_estimate(tq, n_pad) > 0.7 * phys_vmem:
        # v7x (64 MiB) guard: the f32 (tq, n_pad) temporaries quadruple at tq=256.
        tq, nq, n_pad = _plan_tiles(N, 128)

    vmem_cap = min(int(0.75 * phys_vmem), 100 * 2**20)   # ~96 MiB v4/v5e/v6e, ~48 MiB v7x
    vmem_limit = int(min(vmem_cap, max(32 * 2**20, 1.5 * vmem_estimate(tq, n_pad))))

    # ---- layout plumbing (done once, outside the kernel) --------------------
    # Fold qk_scale into the q half; zero-pad D -> d_pad and latent -> l_pad.
    wq = w_qk[:, :latent_dim] * scale
    wk = w_qk[:, latent_dim:]
    wq_p = jnp.pad(wq, ((0, d_pad - D), (0, l_pad - latent_dim))).astype(matmul_dtype)
    wk_p = jnp.pad(wk, ((0, d_pad - D), (0, l_pad - latent_dim))).astype(matmul_dtype)
    bq_p = jnp.pad(b_qk[:latent_dim] * scale,
                   (0, l_pad - latent_dim)).reshape(1, l_pad).astype(jnp.float32)
    bk_p = jnp.pad(b_qk[latent_dim:],
                   (0, l_pad - latent_dim)).reshape(1, l_pad).astype(jnp.float32)

    x_p = jnp.pad(x, ((0, 0), (0, n_pad - N), (0, d_pad - D))).astype(matmul_dtype)
    y_p = jnp.pad(y, ((0, 0), (0, n_pad - N), (0, c_pad - C))).astype(matmul_dtype)

    kernel = functools.partial(_csa_kernel, N, n_pad, tq)

    out = pl.pallas_call(
        kernel,
        out_shape=jax.ShapeDtypeStruct((B, n_pad, c_pad), out_dtype),
        grid_spec=pltpu.PrefetchScalarGridSpec(
            num_scalar_prefetch=0,
            grid=(B, nq),
            in_specs=[
                pl.BlockSpec((None, n_pad, d_pad), lambda b, q: (b, 0, 0)),   # x
                pl.BlockSpec((None, n_pad, c_pad), lambda b, q: (b, 0, 0)),   # y
                pl.BlockSpec((d_pad, l_pad), lambda b, q: (0, 0)),            # Wq
                pl.BlockSpec((d_pad, l_pad), lambda b, q: (0, 0)),            # Wk
                pl.BlockSpec((1, l_pad), lambda b, q: (0, 0)),                # bq
                pl.BlockSpec((1, l_pad), lambda b, q: (0, 0)),                # bk
            ],
            out_specs=pl.BlockSpec((None, tq, c_pad), lambda b, q: (b, q, 0)),
            scratch_shapes=[pltpu.VMEM((n_pad, l_pad), matmul_dtype)],
        ),
        compiler_params=pltpu.CompilerParams(
            # Batch axis parallel (v7x dual TensorCores); q-tile axis must be
            # "arbitrary" because the k scratch is written at q-tile 0 and
            # reused by the later q tiles of the same batch element.
            dimension_semantics=("parallel", "arbitrary"),
            vmem_limit_bytes=vmem_limit),
    )(x_p, y_p, wq_p, wk_p, bq_p, bk_p)

    # TODO(synk): the un-padding slice costs one extra HBM pass over the output.
    return out[:, :N, :C]


def cs_attention_ref(x, y, w_qk, b_qk, latent_dim, qk_scale=None):
    """Pure-JAX f32 reference matching the PyTorch forward exactly."""
    scale = qk_scale if qk_scale is not None else float(latent_dim) ** (-0.5)
    B, N, C = y.shape
    qk = jnp.einsum("bnd,df->bnf", x, w_qk) + b_qk          # (B, N, 2*latent)
    qk = qk.reshape(B, N, 2, latent_dim).transpose(2, 0, 1, 3)
    q, k = qk[0], qk[1]
    q = q * scale
    attn = jax.nn.softmax(jnp.einsum("bql,bkl->bqk", q, k), axis=-1)
    return jnp.einsum("bqk,bkc->bqc", attn, y)


if __name__ == "__main__":
    def make_inputs(key, B, N, dim, C, latent):
        kx, ky, kw, kb = jax.random.split(key, 4)
        x = jax.random.normal(kx, (B, N, dim), dtype=jnp.float32)
        y = jax.random.normal(ky, (B, N, C), dtype=jnp.float32)
        # nn.Linear(dim, 2*latent) weights, stored pre-transposed (dim, 2*latent).
        w = jax.random.normal(kw, (dim, 2 * latent), dtype=jnp.float32) * 0.05
        b = jax.random.normal(kb, (2 * latent,), dtype=jnp.float32) * 0.05
        return x, y, w, b

    TOL = dict(atol=1e-2, rtol=1e-2)  # bf16 MXU operands, f32 accumulation

    # (1) small shapes consistent with the module's forward
    B, N, dim, C, latent = 2, 8, 32, 32, 16
    x, y, w, b = make_inputs(jax.random.PRNGKey(0), B, N, dim, C, latent)
    out = jax.block_until_ready(cs_attention(x, y, w, b, latent))
    ref = cs_attention_ref(x, y, w, b, latent)
    assert out.shape == (B, N, C)
    assert jnp.allclose(out, ref, **TOL), "mismatch (small)"

    # (2) forces multiple q tiles + padded-key masking (N=200, tq capped at 128)
    B, N, dim, C, latent = 2, 200, 32, 32, 16
    x, y, w, b = make_inputs(jax.random.PRNGKey(1), B, N, dim, C, latent)
    out = jax.block_until_ready(cs_attention(x, y, w, b, latent, tq_max=128))
    ref = cs_attention_ref(x, y, w, b, latent)
    assert out.shape == (B, N, C)
    assert jnp.allclose(out, ref, **TOL), "mismatch (tiled)"

    # (3) same shapes with hardware-default (generation-aware) tile choice
    out = jax.block_until_ready(cs_attention(x, y, w, b, latent))
    assert out.shape == (B, N, C)
    assert jnp.allclose(out, ref, **TOL), "mismatch (auto-tile)"

    print("KERNEL_OK")
</pallas_src>

<mosaic_0001>
module attributes {stable_mosaic.version = 11 : i64} {
  func.func @_csa_kernel(%arg0: i32, %arg1: i32, %arg2: memref<1x16x128xbf16, #tpu.memory_space<vmem>>, %arg3: memref<1x16x128xbf16, #tpu.memory_space<vmem>>, %arg4: memref<128x128xbf16, #tpu.memory_space<vmem>>, %arg5: memref<128x128xbf16, #tpu.memory_space<vmem>>, %arg6: memref<1x128xf32, #tpu.memory_space<vmem>>, %arg7: memref<1x128xf32, #tpu.memory_space<vmem>>, %arg8: memref<1x16x128xf32, #tpu.memory_space<vmem>>, %arg9: memref<16x128xbf16, #tpu.memory_space<vmem>>) attributes {dimension_semantics = [#tpu.dimension_semantics<parallel>, #tpu.dimension_semantics<arbitrary>], iteration_bounds = array<i64: 2, 1>, scalar_prefetch = 0 : i64, scratch_operands = 1 : i64, tpu.core_type = #tpu.core_type<tc>, window_params = [{transform_indices = @transform_0, window_bounds = array<i64: 1, 16, 128>}, {transform_indices = @transform_1, window_bounds = array<i64: 1, 16, 128>}, {pipeline_mode = #tpu.pipeline_mode<synchronous>, transform_indices = @transform_2, window_bounds = array<i64: 128, 128>}, {pipeline_mode = #tpu.pipeline_mode<synchronous>, transform_indices = @transform_3, window_bounds = array<i64: 128, 128>}, {pipeline_mode = #tpu.pipeline_mode<synchronous>, transform_indices = @transform_4, window_bounds = array<i64: 1, 128>}, {pipeline_mode = #tpu.pipeline_mode<synchronous>, transform_indices = @transform_5, window_bounds = array<i64: 1, 128>}, {transform_indices = @transform_6, window_bounds = array<i64: 1, 16, 128>}]} {
    %c0_i32 = arith.constant 0 : i32
    %0 = arith.cmpi eq, %arg1, %c0_i32 : i32
    %1 = arith.extui %0 : i1 to i32
    %c0_i32_0 = arith.constant 0 : i32
    %2 = arith.cmpi ne, %1, %c0_i32_0 : i32
    scf.if %2 {
      %c0_19 = arith.constant 0 : index
      %c0_20 = arith.constant 0 : index
      %c0_21 = arith.constant 0 : index
      %38 = vector.load %arg2[%c0_19, %c0_20, %c0_21] : memref<1x16x128xbf16, #tpu.memory_space<vmem>>, vector<1x16x128xbf16>
      %39 = vector.shape_cast %38 : vector<1x16x128xbf16> to vector<16x128xbf16>
      %c0_22 = arith.constant 0 : index
      %c0_23 = arith.constant 0 : index
      %40 = vector.load %arg5[%c0_22, %c0_23] : memref<128x128xbf16, #tpu.memory_space<vmem>>, vector<128x128xbf16>
      %cst_24 = arith.constant dense<0.000000e+00> : vector<16x128xf32>
      %41 = tpu.matmul %39, %40, %cst_24 {dimension_numbers = #tpu.dot_dimension_numbers<[1], [0], [0], [1], [0, 0, 1, 1], [], []>} : vector<16x128xbf16>, vector<128x128xbf16>, vector<16x128xf32> -> vector<16x128xf32>
      %c0_25 = arith.constant 0 : index
      %c0_26 = arith.constant 0 : index
      %42 = vector.load %arg7[%c0_25, %c0_26] : memref<1x128xf32, #tpu.memory_space<vmem>>, vector<1x128xf32>
      %43 = vector.broadcast %42 : vector<1x128xf32> to vector<16x128xf32>
      %44 = arith.addf %41, %43 : vector<16x128xf32>
      %45 = arith.truncf %44 : vector<16x128xf32> to vector<16x128xbf16>
      %c0_27 = arith.constant 0 : index
      %c0_28 = arith.constant 0 : index
      %46 = vector.load %arg9[%c0_27, %c0_28] : memref<16x128xbf16, #tpu.memory_space<vmem>>, vector<16x128xbf16>
      tpu.vector_store %arg9[%c0_27, %c0_28], %45 {strides = array<i32>} : memref<16x128xbf16, #tpu.memory_space<vmem>>, vector<16x128xbf16>,
    } else {
    }
    %c16_i32 = arith.constant 16 : i32
    %3 = arith.muli %arg1, %c16_i32 : i32
    %4 = tpu.assume_multiple %3, 16 : i32
    %c0 = arith.constant 0 : index
    %5 = arith.index_cast %4 : i32 to index
    %c0_1 = arith.constant 0 : index
    %6 = vector.load %arg2[%c0, %5, %c0_1] : memref<1x16x128xbf16, #tpu.memory_space<vmem>>, vector<1x16x128xbf16>
    %7 = vector.shape_cast %6 : vector<1x16x128xbf16> to vector<16x128xbf16>
    %c0_2 = arith.constant 0 : index
    %c0_3 = arith.constant 0 : index
    %8 = vector.load %arg4[%c0_2, %c0_3] : memref<128x128xbf16, #tpu.memory_space<vmem>>, vector<128x128xbf16>
    %cst = arith.constant dense<0.000000e+00> : vector<16x128xf32>
    %9 = tpu.matmul %7, %8, %cst {dimension_numbers = #tpu.dot_dimension_numbers<[1], [0], [0], [1], [0, 0, 1, 1], [], []>} : vector<16x128xbf16>, vector<128x128xbf16>, vector<16x128xf32> -> vector<16x128xf32>
    %c0_4 = arith.constant 0 : index
    %c0_5 = arith.constant 0 : index
    %10 = vector.load %arg6[%c0_4, %c0_5] : memref<1x128xf32, #tpu.memory_space<vmem>>, vector<1x128xf32>
    %11 = vector.broadcast %10 : vector<1x128xf32> to vector<16x128xf32>
    %12 = arith.addf %9, %11 : vector<16x128xf32>
    %13 = arith.truncf %12 : vector<16x128xf32> to vector<16x128xbf16>
    %c0_6 = arith.constant 0 : index
    %c0_7 = arith.constant 0 : index
    %14 = vector.load %arg9[%c0_6, %c0_7] : memref<16x128xbf16, #tpu.memory_space<vmem>>, vector<16x128xbf16>
    %cst_8 = arith.constant dense<0.000000e+00> : vector<16x16xf32>
    %15 = tpu.matmul %13, %14, %cst_8 {dimension_numbers = #tpu.dot_dimension_numbers<[1], [1], [0], [0], [0, 0, 1, 0], [], []>} : vector<16x128xbf16>, vector<16x128xbf16>, vector<16x16xf32> -> vector<16x16xf32>
    %16 = tpu.iota {dimensions = array<i32: 1>} : vector<16x16xi32>
    %c8_i32 = arith.constant 8 : i32
    %17 = vector.broadcast %c8_i32 : i32 to vector<16x16xi32>
    %18 = arith.cmpi slt, %16, %17 : vector<16x16xi32>
    %cst_9 = arith.constant 0xFF800000 : f32
    %19 = vector.broadcast %cst_9 : f32 to vector<16x16xf32>
    %20 = arith.select %18, %15, %19 : vector<16x16xi1>, vector<16x16xf32>
    %cst_10 = arith.constant dense<0xFF800000> : vector<16xf32>
    %21 = vector.multi_reduction <maximumf>, %20, %cst_10 [1] : vector<16x16xf32> to vector<16xf32>
    %22 = vector.shape_cast %21 : vector<16xf32> to vector<16x1xf32>
    %23 = vector.broadcast %22 : vector<16x1xf32> to vector<16x16xf32>
    %24 = arith.subf %20, %23 : vector<16x16xf32>
    %25 = math.exp %24 : vector<16x16xf32>
    %cst_11 = arith.constant dense<0.000000e+00> : vector<16xf32>
    %26 = vector.multi_reduction <add>, %25, %cst_11 [1] : vector<16x16xf32> to vector<16xf32>
    %27 = vector.shape_cast %26 : vector<16xf32> to vector<16x1xf32>
    %28 = tpu.reciprocal %27 {approx = true} : vector<16x1xf32> -> vector<16x1xf32>
    %29 = vector.broadcast %28 : vector<16x1xf32> to vector<16x16xf32>
    %30 = arith.mulf %25, %29 : vector<16x16xf32>
    %c0_12 = arith.constant 0 : index
    %c0_13 = arith.constant 0 : index
    %c0_14 = arith.constant 0 : index
    %31 = vector.load %arg3[%c0_12, %c0_13, %c0_14] : memref<1x16x128xbf16, #tpu.memory_space<vmem>>, vector<1x16x128xbf16>
    %32 = vector.shape_cast %31 : vector<1x16x128xbf16> to vector<16x128xbf16>
    %33 = arith.truncf %30 : vector<16x16xf32> to vector<16x16xbf16>
    %cst_15 = arith.constant dense<0.000000e+00> : vector<16x128xf32>
    %34 = tpu.matmul %33, %32, %cst_15 {dimension_numbers = #tpu.dot_dimension_numbers<[1], [0], [0], [1], [0, 0, 1, 1], [], []>} : vector<16x16xbf16>, vector<16x128xbf16>, vector<16x128xf32> -> vector<16x128xf32>
    %c0_16 = arith.constant 0 : index
    %c0_17 = arith.constant 0 : index
    %c0_18 = arith.constant 0 : index
    %35 = vector.load %arg8[%c0_16, %c0_17, %c0_18] : memref<1x16x128xf32, #tpu.memory_space<vmem>>, vector<1x16x128xf32>
    %36 = vector.shape_cast %35 : vector<1x16x128xf32> to vector<16x128xf32>
    %37 = vector.shape_cast %34 : vector<16x128xf32> to vector<1x16x128xf32>
    tpu.vector_store %arg8[%c0_16, %c0_17, %c0_18], %37 {strides = array<i32>} : memref<1x16x128xf32, #tpu.memory_space<vmem>>, vector<1x16x128xf32>,
    return
  }
  func.func @transform_0(%arg0: i32, %arg1: i32) -> (i32, i32, i32) {
    %c0_i32 = arith.constant 0 : i32
    %c0_i32_0 = arith.constant 0 : i32
    %c0_i32_1 = arith.constant 0 : i32
    return %arg0, %c0_i32, %c0_i32_0 : i32, i32, i32
  }
  func.func @transform_1(%arg0: i32, %arg1: i32) -> (i32, i32, i32) {
    %c0_i32 = arith.constant 0 : i32
    %c0_i32_0 = arith.constant 0 : i32
    %c0_i32_1 = arith.constant 0 : i32
    return %arg0, %c0_i32, %c0_i32_0 : i32, i32, i32
  }
  func.func @transform_2(%arg0: i32, %arg1: i32) -> (i32, i32) {
    %c0_i32 = arith.constant 0 : i32
    %c0_i32_0 = arith.constant 0 : i32
    %c0_i32_1 = arith.constant 0 : i32
    return %c0_i32, %c0_i32_0 : i32, i32
  }
  func.func @transform_3(%arg0: i32, %arg1: i32) -> (i32, i32) {
    %c0_i32 = arith.constant 0 : i32
    %c0_i32_0 = arith.constant 0 : i32
    %c0_i32_1 = arith.constant 0 : i32
    return %c0_i32, %c0_i32_0 : i32, i32
  }
  func.func @transform_4(%arg0: i32, %arg1: i32) -> (i32, i32) {
    %c0_i32 = arith.constant 0 : i32
    %c0_i32_0 = arith.constant 0 : i32
    %c0_i32_1 = arith.constant 0 : i32
    return %c0_i32, %c0_i32_0 : i32, i32
  }
  func.func @transform_5(%arg0: i32, %arg1: i32) -> (i32, i32) {
    %c0_i32 = arith.constant 0 : i32
    %c0_i32_0 = arith.constant 0 : i32
    %c0_i32_1 = arith.constant 0 : i32
    return %c0_i32, %c0_i32_0 : i32, i32
  }
  func.func @transform_6(%arg0: i32, %arg1: i32) -> (i32, i32, i32) {
    %c0_i32 = arith.constant 0 : i32
    %c0_i32_0 = arith.constant 0 : i32
    return %arg0, %arg1, %c0_i32 : i32, i32, i32
  }
}

</mosaic_0001>

<bundles_post_ra>
// kernel: tpu_custom_call.1
= control target key start
LH: loop header
LB: loop body
LE: loop exit
PB: predicated region body
PF: predicated region fallthrough
CT: control target
= control target key end

     0   :  { %s1710_s0 = inlined_call_operand.hbm [shape: bf16[2,16,128], index: 0, kind: input, shape index: {}]   ;;  %s1711_s1 = inlined_call_operand.hbm [shape: bf16[2,16,128], index: 1, kind: input, shape index: {}]   ;;  %s1712_s2 = inlined_call_operand.hbm [shape: bf16[128,128], index: 2, kind: input, shape index: {}]   ;;  %s1713_s3 = inlined_call_operand.hbm [shape: bf16[128,128], index: 3, kind: input, shape index: {}]   ;;  %s1714_s4 = inlined_call_operand.vmem [shape: f32[1,128], index: 4, kind: input, shape index: {}]   ;;  %s1715_s5 = inlined_call_operand.vmem [shape: f32[1,128], index: 5, kind: input, shape index: {}]   ;;  %s1716_s6 = inlined_call_operand.hbm [shape: f32[2,16,128], index: 6, kind: output, shape index: {}]  }
   0x1   :  { %1727 = sst [smem:[#allocation21_spill]] %s1710_s0 }
   0x2   :  { %1728 = sst [smem:[#allocation22_spill]] %s1712_s2 }
   0x3   :  { %1729 = sst [smem:[#allocation23_spill]] %s1713_s3 }
   0x4   :  { %11 = vsyncpa [#allocation4], 0 }
   0x5   :  { %13 = vsyncpa [#allocation4 + $0x1], 0 }
   0x6   :  { %14 = vsyncpa [#allocation7], 0 }
   0x7   :  { %16 = vsyncpa [#allocation7 + $0x1], 0 }
   0x8   :  { %17 = vsyncpa [#allocation10], 0 }
   0x9   :  { %18 = vsyncpa [#allocation5], 0 }
   0xa   :  { %20 = vsyncpa [#allocation5 + $0x1], 0  ;;  %s1377_s21 = smov 0   ;;  %s1379_s22 = smov 0  }
   0xb   :  { %s1381_s23 = smov 0   ;;  %s1383_s24 = smov 0  }
   0xc   :  { %s1385_s25 = smov 0   ;;  %s1387_s26 = smov 0  }
   0xd LB: > { %1730 = sst [smem:[#allocation17_spill]] %s1317_s23  ;;  %s1408_s27 = sadd.s32 4294967295, %s1329_s26   ;;  %s1329_s26 = sphi %s1387_s26, %s26_s26   ;;  %s1325_s25 = sphi %s1385_s25, %s1757_s25   ;;  %s1321_s24 = sphi %s1383_s24, %s1756_s24   ;;  %s1317_s23 = sphi %s1381_s23, %s1755_s23   ;;  %s1313_s22 = sphi %s1379_s22, %s1759_s22   ;;  %s1309_s21 = sphi %s1377_s21, %s1758_s21  }
   0xe   : > { %1731 = sst [smem:[#allocation18_spill]] %s1325_s25  ;;  %s877_s28 = sadd.s32 4294967294, %s1329_s26  }
   0xf   : > { %p58_p0 = scmp.ne.s32.totalorder %s1313_s22, %s1309_s21  ;;  %p1717_p1 = scmp.eq.s32.totalorder %s1408_s27, 0 }
  0x10   : > { %p200_p3 = scmp.eq.s32.totalorder %s877_s28, 1  ;;  %p878_p5 = scmp.ge.s32.totalorder %s1329_s26, 1 }
  0x11   : > { %p1417_p4 = por %p1717_p1, %p58_p0  ;;  %p207_p7 = scmp.lt.s32.totalorder %s1329_s26, 3 }
  0x12   : > { %p1422_p6 = por %p200_p3, %p58_p0  ;;  %s1331_s8 = smov [#allocation8]  }
  0x13   : > { %s1732_s29 = scalar_select %p1417_p4, 1, 0 }
  0x14   : > { %s1733_s30 = scalar_select %p1422_p6, 1, 0 }
  0x15   : > { %p1427_p8 = pnand %p878_p5, %p207_p7  ;;  %s219_s9 = sshll.u32 %s1331_s8, 4  ;;  %s1431_s9 = int_to_ptr.vmem [resolvable:$true] %s219_s9 }
  0x16   : > { %s1332_s11 = smov [#allocation9]   ;;  %s1736_s2 = sld [smem:[#allocation22_spill]] }
  0x17   : > { %p1012_p9 = pneg %p1427_p8  ;;  %s232_s12 = sshll.u32 %s1332_s11, 4  ;;  %s1442_s12 = int_to_ptr.vmem [resolvable:$true] %s232_s12 }
  0x19   : > { %p1438_p11 = pnand %p1012_p9, %p1717_p1 }
  0x1b   : > { %p1121_p13 = pneg %p1438_p11 }
  0x1c   : > { %s1119_s15 = scalar_lea.hbm %s1736_s2, 1024 }
  0x1d   : > { %p1120_p12 = scmp.ne.s32.totalorder %s1736_s2, %s1119_s15  ;;  %p1126_p5 = scmp.lt.u32.totalorder %s1119_s15, %s1736_s2 }
  0x1f   : > { %p1122_p0 = pnand %p1121_p13, %p1120_p12 }
  0x21   : > { %p1123_p3 = pneg %p1122_p0 }
  0x23   : > { %p1128_p7 = pnand %p1126_p5, %p1123_p3 }
  0x25   : > { %1131 = shalt.err (!%p1128_p7)
}
  0x26   : > { %s1132_s20 = scalar_lea.vmem %s1431_s9, 1024  ;;  %p1140_p2 = scmp.lt.s32.totalorder %s1431_s9, %s1431_s9 }
  0x27   : > { %p1133_p9 = scmp.ne.s32.totalorder %s1431_s9, %s1132_s20  ;;  %p1141_p12 = scmp.lt.s32.totalorder %s1132_s20, %s1132_s20 }
  0x29   : > { %p1135_p10 = pnand %p1133_p9, %p1121_p13  ;;  %p1142_p0 = por %p1141_p12, %p1140_p2 }
  0x2b   : > { %p1136_p1 = pneg %p1135_p10 }
  0x2d   : > { %p1143_p6 = pnand %p1142_p0, %p1136_p1 }
  0x2f   : > { %1146 = shalt.err (!%p1143_p6)
}
  0x30   : > { %s1718_s28 = smov 64   ;;  %s1720_s8 = smov 4  }
  0x31   : > { %1015 = dma.hbm_to_vmem [thread:$0]  (!%p1438_p11), %s1736_s2, 1024, %s1431_s9, [#allocation7], %s1718_s28, %s1718_s28, %s1720_s8  }
  0x32   : > { %s1737_s3 = sld [smem:[#allocation23_spill]] }
  0x38   : > { %s1147_s16 = scalar_lea.hbm %s1737_s3, 1024 }
  0x39   : > { %p1148_p1 = scmp.ne.s32.totalorder %s1737_s3, %s1147_s16  ;;  %p1154_p10 = scmp.lt.u32.totalorder %s1147_s16, %s1737_s3 }
  0x3b   : > { %p1150_p2 = pnand %p1148_p1, %p1121_p13 }
  0x3d   : > { %p1151_p6 = pneg %p1150_p2 }
  0x3f   : > { %p1156_p3 = pnand %p1154_p10, %p1151_p6 }
  0x41   : > { %1159 = shalt.err (!%p1156_p3)
}
  0x42   : > { %s1160_s9 = scalar_lea.vmem %s1442_s12, 1024  ;;  %p1168_p12 = scmp.lt.s32.totalorder %s1442_s12, %s1442_s12 }
  0x43   : > { %p1161_p5 = scmp.ne.s32.totalorder %s1442_s12, %s1160_s9  ;;  %p1169_p0 = scmp.lt.s32.totalorder %s1160_s9, %s1160_s9 }
  0x45   : > { %p1163_p7 = pnand %p1161_p5, %p1121_p13  ;;  %p1170_p1 = por %p1169_p0, %p1168_p12 }
  0x47   : > { %p1164_p9 = pneg %p1163_p7 }
  0x49   : > { %p1171_p2 = pnand %p1170_p1, %p1164_p9 }
  0x4b   : > { %1174 = shalt.err (!%p1171_p2)
}
  0x4c   : > { %1018 = dma.hbm_to_vmem [thread:$0]  (!%p1438_p11), %s1737_s3, 1024, %s1442_s12, [#allocation10], %s1718_s28, %s1718_s28, %s1720_s8  }
  0x4d   : > { %s38_s10 = sadd.s32 1, %s1325_s25  ;;  %s45_s14 = sadd.s32 1, %s1317_s23 }
  0x4e   : > { %p40_p13 = scmp.ge.s32.totalorder %s38_s10, 2  ;;  %p52_p6 = scmp.ne.s32.totalorder %s1317_s23, %s1313_s22 }
  0x4f   : > { %p53_p10 = scmp.eq.s32.totalorder %s1329_s26, 0  ;;  %p1032_p3 = scmp.lt.s32.totalorder %s1329_s26, 2 }
  0x50   : > { %s1761_s10 = smov (%p40_p13, %s38_s10), 0  ;;  %p1739_p7 = scmp.eq.s32.totalorder %s1408_s27, 1 }
  0x51   : > { %1738 = sst [smem:[#allocation19_spill]] %s1761_s10  ;;  %p54_p5 = por %p53_p10, %p52_p6 }
  0x52   : > { %p1512_p9 = por %p1739_p7, %p52_p6  ;;  %s42_s16 = ssub.s32 %s1325_s25, %s1761_s10 }
  0x53   : > { %s252_s17 = sand.u32 1, %s1317_s23   ;;  %p43_p12 = scmp.eq.s32.totalorder %s42_s16, 0 }
  0x54   : > { %s1740_s15 = scalar_select %p1512_p9, 1, 0 }
  0x55   : > { %s1519_s12 = sshll.u32 %s252_s17, 3  ;;  %s921_s18 = sshll.u32 %s1325_s25, 7 }
  0x56   : > { %s1523_s19 = scalar_select %p43_p12, %s1317_s23, %s45_s14  }
  0x57   : > { %s1742_s0 = sld [smem:[#allocation21_spill]]  ;;  %s256_s13 = scalar_lea.vmem [#allocation3], %s1519_s12 }
  0x58   : > { %1741 = sst [smem:[#allocation20_spill]] %s1523_s19  ;;  %s263_s28 = sshll.u32 %s256_s13, 4  ;;  %s1537_s28 = int_to_ptr.vmem [resolvable:$true] %s263_s28 }
  0x59   : > { %p1533_p11 = pnand %p1032_p3, %p54_p5  ;;  %s1542_s20 = scalar_lea.hbm %s1711_s1, %s921_s18 }
  0x5a   : > { %s1544_s9 = scalar_lea.sflag [#allocation4], %s252_s17 }
  0x5b   : > { %p1177_p1 = pneg %p1533_p11 }
  0x5d   : > { %s1528_s11 = scalar_lea.hbm %s1742_s0, %s921_s18  ;;  %s1180_s10 = scalar_lea.hbm %s1742_s0, 256 }
  0x5e   : > { %s1175_s2 = scalar_lea.hbm %s1528_s11, 128  ;;  %p1181_p6 = scmp.lt.u32.totalorder %s1528_s11, %s1742_s0 }
  0x5f   : > { %p1176_p0 = scmp.ne.s32.totalorder %s1528_s11, %s1175_s2  ;;  %p1182_p10 = scmp.lt.u32.totalorder %s1180_s10, %s1175_s2 }
  0x60   : > { %p1184_p5 = scmp.lt.u32.totalorder %s1175_s2, %s1528_s11 }
  0x61   : > { %p1178_p2 = pnand %p1177_p1, %p1176_p0  ;;  %p1183_p3 = por %p1182_p10, %p1181_p6 }
  0x63   : > { %p1179_p13 = pneg %p1178_p2  ;;  %p1185_p7 = por %p1184_p5, %p1183_p3 }
  0x65   : > { %p1186_p12 = pnand %p1185_p7, %p1179_p13 }
  0x67   : > { %1189 = shalt.err (!%p1186_p12)
}
  0x68   : > { %s1190_s8 = scalar_lea.vmem %s1537_s28, 128  ;;  %s1335_s3 = smov [#allocation3]  }
  0x69   : > { %p1191_p0 = scmp.ne.s32.totalorder %s1537_s28, %s1190_s8  ;;  %s1195_s17 = sshll.u32 %s1335_s3, 4  ;;  %s1196_s17 = int_to_ptr.vmem [resolvable:$false] %s1195_s17 }
  0x6a   : > { %s1197_s25 = scalar_lea.vmem %s1196_s17, 256  ;;  %p1198_p4 = scmp.lt.s32.totalorder %s1537_s28, %s1196_s17 }
  0x6b   : > { %p1193_p2 = pnand %p1191_p0, %p1177_p1  ;;  %p1199_p6 = scmp.lt.s32.totalorder %s1197_s25, %s1190_s8 }
  0x6d   : > { %p1194_p9 = pneg %p1193_p2  ;;  %p1200_p10 = por %p1199_p6, %p1198_p4 }
  0x6f   : > { %p1201_p3 = pnand %p1200_p10, %p1194_p9 }
  0x71   : > { %1204 = shalt.err (!%p1201_p3)
}
  0x72   : > { %s1744_s2 = smov 4   ;;  %s1745_s10 = smov 64  }
  0x73   : > { %1022 = dma.hbm_to_vmem [thread:$0]  (!%p1533_p11), %s1528_s11, 128, %s1537_s28, %s1544_s9, %s1745_s10, %s1745_s10, %s1744_s2  }
  0x74   : > { %s277_s18 = scalar_lea.vmem [#allocation6], %s1519_s12  ;;  %s273_s14 = sand.u32 1, %s1329_s26  }
  0x75   : > { %s284_s19 = sshll.u32 %s277_s18, 4  ;;  %s1579_s13 = scalar_lea.sflag [#allocation7], %s273_s14  ;;  %s1577_s19 = int_to_ptr.vmem [resolvable:$true] %s284_s19 }
  0x76   : > { %s1205_s8 = scalar_lea.hbm %s1542_s20, 128  ;;  %s1210_s25 = scalar_lea.hbm %s1711_s1, 256 }
  0x77   : > { %p1206_p4 = scmp.ne.s32.totalorder %s1542_s20, %s1205_s8  ;;  %p1211_p5 = scmp.lt.u32.totalorder %s1542_s20, %s1711_s1 }
  0x78   : > { %p1212_p7 = scmp.lt.u32.totalorder %s1210_s25, %s1205_s8  ;;  %p1214_p0 = scmp.lt.u32.totalorder %s1205_s8, %s1542_s20 }
  0x79   : > { %p1208_p9 = pnand %p1206_p4, %p1177_p1 }
  0x7a   : > { %p1213_p12 = por %p1212_p7, %p1211_p5 }
  0x7b   : > { %p1209_p13 = pneg %p1208_p9 }
  0x7c   : > { %p1215_p2 = por %p1214_p0, %p1213_p12 }
  0x7e   : > { %p1216_p6 = pnand %p1215_p2, %p1209_p13 }
  0x80   : > { %1219 = shalt.err (!%p1216_p6)
}
  0x81   : > { %s1220_s28 = scalar_lea.vmem %s1577_s19, 128  ;;  %s1336_s12 = smov [#allocation6]  }
  0x82   : > { %p1221_p10 = scmp.ne.s32.totalorder %s1577_s19, %s1220_s28  ;;  %s1225_s11 = sshll.u32 %s1336_s12, 4  ;;  %s1226_s11 = int_to_ptr.vmem [resolvable:$false] %s1225_s11 }
  0x83   : > { %s1227_s0 = scalar_lea.vmem %s1226_s11, 256  ;;  %p1228_p9 = scmp.lt.s32.totalorder %s1577_s19, %s1226_s11 }
  0x84   : > { %p1223_p3 = pnand %p1221_p10, %p1177_p1  ;;  %p1229_p5 = scmp.lt.s32.totalorder %s1227_s0, %s1220_s28 }
  0x86   : > { %p1224_p4 = pneg %p1223_p3  ;;  %p1230_p7 = por %p1229_p5, %p1228_p9 }
  0x88   : > { %p1231_p12 = pnand %p1230_p7, %p1224_p4 }
  0x8a   : > { %1234 = shalt.err (!%p1231_p12)
}
  0x8b   : > { %1025 = dma.hbm_to_vmem [thread:$0]  (!%p1533_p11), %s1542_s20, 128, %s1577_s19, %s1579_s13, %s1745_s10, %s1745_s10, %s1744_s2  }
  0x8c   : > { %296 = sbr.rel (%p1427_p8) target bundleno = 1178 (0x49a), region = 44  ;;  %s1611_s23 = sand.u32 (!%p1427_p8), 1, %s1313_s22  }
  0x8d   : > { %s889_s9 = sshll.u32 (!%p1427_p8), %s1611_s23, 3  ;;  %s299_s18 = scalar_lea.sflag (!%p1427_p8), [#allocation4], %s1611_s23 }
  0x8e   : > { %s1615_s14 = scalar_lea.vmem (!%p1427_p8), [#allocation3], %s889_s9  ;;  %p1746_p1 = scmp.ne.s32.totalorder (!%p1427_p8), %s1732_s29, 0 }
  0x93   : > { %1288 = dma.done.wait (%p1746_p1), %s299_s18, 128  }
  0x94   : > { %1290 = vsyncadd (%p1746_p1), %s299_s18, 4294967168  ;;  %s307_s16 = sand.u32 1, %s1408_s27   ;;  %s1622_s20 = scalar_lea.vmem [#allocation6], %s889_s9 }
  0x95   : > { %s308_s7 = scalar_lea.sflag [#allocation7], %s307_s16 }
  0x96   : > { %1292 = dma.done.wait (%p1746_p1), %s308_s7, 128  }
  0x97   : > { %1294 = vsyncadd (%p1746_p1), %s308_s7, 4294967168  ;;  %p1747_p8 = scmp.eq.s32.totalorder %s1408_s27, 0 }
  0x99   : > { %1296 = dma.done.wait (%p1747_p8), [#allocation7], 1024   ;;  %p1748_p11 = pmov %p1747_p8 }
  0x9a   : > { %p1749_p13 = pmov %p1747_p8 }
  0x9b   : > { %1298 = vsyncadd (%p1748_p11), [#allocation7], 4294966272 }
  0x9c   : > { %1300 = dma.done.wait (%p1749_p13), [#allocation10], 1024   ;;  %p1750_p0 = pmov %p1747_p8 }
  0x9d   : > { %v1337_v0 = vmov 0.0   ;;  %vm1338_vm0 = vmmov 0   ;;  %v1092_v1 = vld [vmem:[#allocation9] sm:$0xff]   ;;  %v1093_v2 = vld [vmem:[#allocation9 + $0x8] sm:$0xff]   ;;  %v1095_v5 = vld [vmem:[#allocation9 + $0x10] sm:$0xff]   ;;  %v649_v35 = vlaneseq  ;;  %vm654_vm2 = vcmask 130048  }
  0x9e   : > { %1302 = vsyncadd (%p1750_p0), [#allocation10], 4294966272  ;;  %946 = vmatprep.subr.bf16.mxu0 %v1337_v0  ;;  %966 = vmatprep.subr.bf16.mxu1 %v1337_v0  ;;  %v1094_v3 = vld [vmem:[#allocation8] sm:$0xff]   ;;  %v1096_v4 = vld [vmem:[#allocation8 + $0x8] sm:$0xff]   ;;  %s893_s19 = sshll.u32 %s1611_s23, 4  ;;  %s923_s3 = sshll.u32 %s1321_s24, 8 }
  0x9f   : > { %962 = vmatprep.mubr.msk.bf16.mxu0 %vm1338_vm0, %v1337_v0  ;;  %982 = vmatprep.mubr.msk.bf16.mxu1 %vm1338_vm0, %v1337_v0  ;;  %v1098_v6 = vld [vmem:[#allocation8 + $0x10] sm:$0xff]   ;;  %v1097_v7 = vld [vmem:[#allocation9 + $0x18] sm:$0xff]   ;;  %v1099_v9 = vld [vmem:[#allocation9 + $0x20] sm:$0xff]   ;;  %v650_v36 = vand.u32 127, %v649_v35  ;;  %s352_s13 = scalar_lea.vmem [#allocation11], %s893_s19  ;;  %s1661_s28 = scalar_lea.hbm %s1716_s6, %s923_s3 }
  0xa0   : > { %947 = vmatpush3.bf16.msra.mxu0 %v1092_v1  ;;  %967 = vmatpush3.bf16.msra.mxu1 %v1094_v3  ;;  %v1100_v8 = vld [vmem:[#allocation8 + $0x18] sm:$0xff]   ;;  %v1102_v10 = vld [vmem:[#allocation8 + $0x20] sm:$0xff]   ;;  %v1101_v11 = vld [vmem:[#allocation9 + $0x28] sm:$0xff]   ;;  %s748_s8 = sshll.u32 %s352_s13, 4  ;;  %s733_s12 = scalar_lea.sflag [#allocation5], %s1611_s23  ;;  %s1656_s8 = int_to_ptr.vmem [resolvable:$true] %s748_s8 }
  0xa1   : > { %948 = vmatprep.subr.bf16.mxu0 %v1337_v0  ;;  %968 = vmatprep.subr.bf16.mxu1 %v1337_v0  ;;  %v1104_v12 = vld [vmem:[#allocation8 + $0x28] sm:$0xff]   ;;  %v1103_v13 = vld [vmem:[#allocation9 + $0x30] sm:$0xff]   ;;  %v1105_v15 = vld [vmem:[#allocation9 + $0x38] sm:$0xff]   ;;  %vm651_vm1 = vcmp.lt.s32.totalorder %v650_v36, 8  ;;  %s1235_s11 = scalar_lea.vmem %s1656_s8, 256  ;;  %p1751_p6 = scmp.ne.s32.totalorder %s1740_s15, 0 }
  0xa2   : > { %v1106_v14 = vld [vmem:[#allocation8 + $0x30] sm:$0xff]   ;;  %v1108_v16 = vld [vmem:[#allocation8 + $0x38] sm:$0xff]   ;;  %v1107_v17 = vld [vmem:[%s1615_s14] sm:$0xff]   ;;  %p1236_p2 = scmp.ne.s32.totalorder %s1656_s8, %s1235_s11  ;;  %s1339_s24 = smov [#allocation11]  }
  0xa3   : > { %v1109_v18 = vld [vmem:[%s1615_s14] sm:$0xff]   ;;  %v1110_v55 = vld [vmem:[%s1622_s20] sm:$0xff]   ;;  %s1239_s0 = sshll.u32 %s1339_s24, 4  ;;  %s1240_s0 = int_to_ptr.vmem [resolvable:$false] %s1239_s0 }
  0xa4   : > { %949 = vmatpush3.bf16.msra.mxu0 %v1093_v2  ;;  %969 = vmatpush3.bf16.msra.mxu1 %v1096_v4  ;;  %v894_v19 = vld [vmem:[%s1715_s5] ss:$0 sm:$0xff]  ;;  %p1237_p10 = pnand %p1236_p2, %p1751_p6  ;;  %s1241_s9 = scalar_lea.vmem %s1240_s0, 512 }
  0xa5   : > { %950 = vmatprep.subr.bf16.mxu0 %v1337_v0  ;;  %970 = vmatprep.subr.bf16.mxu1 %v1337_v0  ;;  %v904_v21 = vld [vmem:[%s1714_s4] ss:$0 sm:$0xff]  ;;  %p1242_p4 = scmp.lt.s32.totalorder %s1656_s8, %s1240_s0  ;;  %p1243_p9 = scmp.lt.s32.totalorder %s1241_s9, %s1235_s11 }
  0xa6   : > { %p1238_p3 = pneg %p1237_p10 }
  0xa7   : > { %p1244_p5 = por %p1243_p9, %p1242_p4 }
  0xa8   : > { %951 = vmatpush3.bf16.msra.mxu0 %v1095_v5  ;;  %971 = vmatpush3.bf16.msra.mxu1 %v1098_v6 }
  0xa9   : > { %952 = vmatprep.subr.bf16.mxu0 %v1337_v0  ;;  %972 = vmatprep.subr.bf16.mxu1 %v1337_v0  ;;  %p1245_p7 = pnand %p1244_p5, %p1238_p3 }
  0xac   : > { %953 = vmatpush3.bf16.msra.mxu0 %v1097_v7  ;;  %973 = vmatpush3.bf16.msra.mxu1 %v1100_v8 }
  0xad   : > { %954 = vmatprep.subr.bf16.mxu0 %v1337_v0  ;;  %974 = vmatprep.subr.bf16.mxu1 %v1337_v0 }
  0xb0   : > { %955 = vmatpush3.bf16.msra.mxu0 %v1099_v9  ;;  %975 = vmatpush3.bf16.msra.mxu1 %v1102_v10 }
  0xb1   : > { %956 = vmatprep.subr.bf16.mxu0 %v1337_v0  ;;  %976 = vmatprep.subr.bf16.mxu1 %v1337_v0 }
  0xb4   : > { %957 = vmatpush3.bf16.msra.mxu0 %v1101_v11  ;;  %977 = vmatpush3.bf16.msra.mxu1 %v1104_v12 }
  0xb5   : > { %958 = vmatprep.subr.bf16.mxu0 %v1337_v0  ;;  %978 = vmatprep.subr.bf16.mxu1 %v1337_v0 }
  0xb8   : > { %959 = vmatpush3.bf16.msra.mxu0 %v1103_v13  ;;  %979 = vmatpush3.bf16.msra.mxu1 %v1106_v14 }
  0xb9   : > { %960 = vmatprep.subr.bf16.mxu0 %v1337_v0  ;;  %980 = vmatprep.subr.bf16.mxu1 %v1337_v0 }
  0xbc   : > { %961 = vmatpush3.bf16.msra.mxu0 %v1105_v15  ;;  %981 = vmatpush3.bf16.msra.mxu1 %v1108_v16 }
  0xbd   : > { %986 = vmatprep.subr.bf16.mxu0 %v1337_v0  ;;  %992 = vmatprep.subr.bf16.mxu1 %v1337_v0 }
  0xbf   : > { %963 = vmatmul.mubr.bf16.vlgmr.msra.gmra.mrb[0].mxu0 %v1107_v17  ;;  %983 = vmatmul.mubr.bf16.vlgmr.msra.gmra.mrb[0].mxu1 %v1109_v18 }
  0xc0   : > { %988 = vmatprep.mubr.msk.bf16.mxu0 %vm1338_vm0, %v1337_v0  ;;  %994 = vmatprep.mubr.msk.bf16.mxu1 %vm1338_vm0, %v1337_v0 }
  0xc1   : > { %993 = vmatpush3.bf16.msra.mxu1 %v1110_v55 }
 0x192   : > { %v472_v20 = vpop.f32.mrb[0].mxu0  ;;  %v599_v24 = vpop.f32.mrb[0].mxu1 }
 0x193   : > { %v964_v22 = vpop.f32.mrb[1].mxu0  ;;  %v473_v25 = vadd.f32 %v894_v19, %v472_v20  ;;  %v600_v28 = vadd.f32 %v904_v21, %v599_v24  ;;  %v984_v29 = vpop.f32.mrb[1].mxu1 }
 0x194   : > { %v475_v23 = vpop.f32.mrb[2].mxu0  ;;  %v602_v30 = vpop.f32.mrb[2].mxu1 }
 0x195   : > { %v476_v26 = vadd.f32 %v894_v19, %v475_v23  ;;  %v965_v27 = vpop.f32.mrb[3].mxu0  ;;  %v603_v32 = vadd.f32 %v904_v21, %v602_v30  ;;  %v985_v33 = vpop.f32.mrb[3].mxu1 }
 0x197   : > { %v479_v31 = vpack.c.bf16 %v476_v26, %v473_v25  ;;  %v606_v34 = vpack.c.bf16 %v603_v32, %v600_v28 }
 0x199   : > { %987 = vmatpush3.bf16.xpose.msra.mxu0 %v479_v31 }
 0x1a0   : > { %989 = vmatmul.mubr.bf16.vlgmr.msra.gmra.mrb[4].mxu0 %v606_v34 }
 0x273   : > { %v642_v37 = vpop.f32.mrb[4].mxu0 }
 0x274   : > { %v652_v38 = vsel %vm651_vm1, %v642_v37, -inf  ;;  %v990_v39 = vpop.f32.mrb[5].mxu0 }
 0x275   : > { %v645_v40 = vpop.f32.mrb[6].mxu0  ;;  %v655_v41 = vsel %vm654_vm2, %v652_v38, -inf }
 0x276   : > { %v653_v42 = vsel %vm651_vm1, %v645_v40, -inf  ;;  %656 = vmax.xlane.f32.xlu0 %v655_v41  ;;  %v991_v43 = vpop.f32.mrb[7].mxu0 }
 0x277   : > { %v658_v44 = vsel %vm654_vm2, %v653_v42, -inf }
 0x27a   : > { %659 = vmax.xlane.f32.xlu0 %v658_v44 }
 0x303   : > { %v657_v45 = vpop.xlane.xlu0 %656 }
 0x304   : > { %v661_v46 = vsub.f32 %v652_v38, %v657_v45 }
 0x306   : > { %v663_v47 = vmul.f32 1.442695, %v661_v46 }
 0x307   : > { %v660_v48 = vpop.xlane.xlu0 %659 }
 0x308   : > { %1111 = vpow2.f32 %v663_v47  ;;  %v662_v49 = vsub.f32 %v653_v42, %v660_v48 }
 0x30a   : > { %v665_v50 = vmul.f32 1.442695, %v662_v49 }
 0x30c   : > { %1113 = vpow2.f32 %v665_v50 }
 0x312   : > { %v1112_v51 = vpop.eup %1111 }
 0x313   : > { %v667_v52 = vsel %vm654_vm2, %v1112_v51, 0.0 }
 0x314   : > { %668 = vadd.xlane.f32.xlu1 %v667_v52 }
 0x316   : > { %v1114_v53 = vpop.eup %1113 }
 0x317   : > { %v670_v54 = vsel %vm654_vm2, %v1114_v53, 0.0 }
 0x318   : > { %671 = vadd.xlane.f32.xlu1 %v670_v54 }
 0x3a1   : > { %v669_v56 = vpop.xlane.xlu1 %668 }
 0x3a2   : > { %1115 = vrcp.f32 %v669_v56 }
 0x3a5   : > { %v672_v57 = vpop.xlane.xlu1 %671 }
 0x3a6   : > { %1117 = vrcp.f32 %v672_v57 }
 0x3ac   : > { %v1116_v58 = vpop.eup %1115 }
 0x3ad   : > { %v675_v60 = vmul.f32 %v1116_v58, %v1112_v51 }
 0x3b0   : > { %v1118_v59 = vpop.eup %1117 }
 0x3b1   : > { %v676_v61 = vmul.f32 %v1118_v59, %v1114_v53 }
 0x3b3   : > { %v679_v62 = vpack.c.bf16 %v676_v61, %v675_v60 }
 0x3b5   : > { %995 = vmatmul.mubr.msk.bf16.vlgmr.msra.gmra.mrb[4].mxu1 %vm654_vm2, %v679_v62 }
 0x488   : > { %v723_v63 = vpop.f32.mrb[4].mxu1 }
 0x489   : > { %730 = vst [vmem:[%s352_s13] sm:$0xff] %v723_v63  ;;  %v996_v0 = vpop.f32.mrb[5].mxu1 }
 0x48a   : > { %v726_v1 = vpop.f32.mrb[6].mxu1 }
 0x48b   : > { %731 = vst [vmem:[%s352_s13 + $0x8] sm:$0xff] %v726_v1  ;;  %v997_v2 = vpop.f32.mrb[7].mxu1 }
 0x48c   : > { %1248 = shalt.err (!%p1245_p7)
}
 0x48d   : > { %s1249_s18 = scalar_lea.hbm %s1661_s28, 256  ;;  %s1253_s7 = scalar_lea.hbm %s1716_s6, 512 }
 0x48e   : > { %p1250_p12 = scmp.ne.s32.totalorder %s1661_s28, %s1249_s18  ;;  %p1254_p11 = scmp.lt.u32.totalorder %s1661_s28, %s1716_s6 }
 0x48f   : > { %p1255_p13 = scmp.lt.u32.totalorder %s1253_s7, %s1249_s18  ;;  %p1257_p2 = scmp.lt.u32.totalorder %s1249_s18, %s1661_s28 }
 0x490   : > { %p1251_p1 = pnand %p1250_p12, %p1751_p6 }
 0x491   : > { %p1256_p0 = por %p1255_p13, %p1254_p11 }
 0x492   : > { %p1252_p8 = pneg %p1251_p1 }
 0x493   : > { %p1258_p10 = por %p1257_p2, %p1256_p0 }
 0x495   : > { %p1259_p3 = pnand %p1258_p10, %p1252_p8 }
 0x497   : > { %1262 = shalt.err (!%p1259_p3)
}
 0x498   : > { %s1340_s29 = smov 128   ;;  %s1341_s2 = smov 8  }
 0x499   : > { %1010 = dma.vmem_to_hbm [thread:$0]  (%p1751_p6), %s1656_s8, 256, %s1661_s28, %s733_s12, %s1340_s29, %s1340_s29, %s1341_s2  }
 0x49a PF: > { %s763_s10 = sand.u32 1, %s1309_s21   ;;  %p1752_p4 = scmp.ne.s32.totalorder %s1733_s30, 0 }
 0x49b   : > { %p1753_p9 = scmp.ge.s32.totalorder %s1329_s26, 2  ;;  %s764_s19 = scalar_lea.sflag [#allocation5], %s763_s10 }
 0x49d   : > { %p1027_p5 = pnand %p1753_p9, %p1752_p4 }
 0x49f   : > { %1304 = dma.done.wait (!%p1027_p5), %s764_s19, 256  }
 0x4a0   : > { %1306 = vsyncadd (!%p1027_p5), %s764_s19, 4294967040  ;;  %s26_s26 = sadd.s32 1, %s1329_s26   ;;  %s1754_s13 = sld [smem:[#allocation17_spill]] }
 0x4a1   : > { %p23_p7 = scmp.ge.s32.totalorder %s26_s26, 4   ;;  %s1755_s23 = sld [smem:[#allocation20_spill]] }
 0x4a2   : > { %s1756_s24 = sld [smem:[#allocation18_spill]]  ;;  %s1757_s25 = sld [smem:[#allocation19_spill]] }
 0x4a3   : > { %s1758_s21 = smov %s1313_s22  ;;  %25 = sbr.rel (!%p23_p7) target bundleno = 13 (0xd), region = 115 }
 0x4a6   : > { %s1759_s22 = smov %s1754_s13 }
 0x4aa   :  { %769 = vsyncpa [#allocation4], 1 }
 0x4ab   :  { %771 = vsyncpa [#allocation4 + $0x1], 1 }
 0x4ac   :  { %772 = vsyncpa [#allocation7], 1 }
 0x4ad   :  { %774 = vsyncpa [#allocation7 + $0x1], 1 }
 0x4ae   :  { %775 = vsyncpa [#allocation10], 1 }
 0x4af   :  { %776 = vsyncpa [#allocation5], 1 }
 0x4b0   :  { %778 = vsyncpa [#allocation5 + $0x1], 1 }

</bundles_post_ra>
